<compile_context>
chip_gen: v5e
topology: v5e:2x2
jax: 0.10.0
libtpu: 0.0.40
codegen_flags: <defaults>
</compile_context>

<pallas_src>
import jax
import jax.numpy as jnp
from jax.experimental import pallas as pl
from jax.experimental.pallas import tpu as pltpu


# ---------------------------------------------------------------------------
# Elementwise per-channel affine: out = inv_s * x + bias   (bias = -mean/sigma)
# ---------------------------------------------------------------------------
def _normalize_kernel(inv_s_ref, bias_ref, ub_ref, lb_ref, ub_out_ref, lb_out_ref):
    inv_s = inv_s_ref[...]          # (C, 1)
    bias = bias_ref[...]            # (C, 1)
    ub_out_ref[...] = inv_s * ub_ref[...] + bias
    lb_out_ref[...] = inv_s * lb_ref[...] + bias


# ---------------------------------------------------------------------------
# Identity matrix: one (tile_m, n) full-width row block per grid step.
# ---------------------------------------------------------------------------
def _eye_row_block_kernel(o_ref):
    i = pl.program_id(0)
    tm, n = o_ref.shape
    rows = i * tm + jax.lax.broadcasted_iota(jnp.int32, (tm, n), 0)
    cols = jax.lax.broadcasted_iota(jnp.int32, (tm, n), 1)
    o_ref[...] = (rows == cols).astype(o_ref.dtype)


def _round_up(x, m):
    return ((x + m - 1) // m) * m


def pallas_eye(n, dtype=jnp.float32, block_bytes=4 * 1024 * 1024):
    """n x n identity built on-device; store-bandwidth-bound row-block kernel."""
    itemsize = jnp.dtype(dtype).itemsize
    # Rows per block: multiple of 8, <= 512, block <= ~4 MiB, >= 8.
    rows_by_budget = max(8, (block_bytes // (n * itemsize)) // 8 * 8)
    tile_m = min(512, rows_by_budget, _round_up(n, 8))
    grid_m = pl.cdiv(n, tile_m)     # partial last block is clipped by Pallas
    return pl.pallas_call(
        _eye_row_block_kernel,
        out_shape=jax.ShapeDtypeStruct((n, n), dtype),
        grid=(grid_m,),
        out_specs=pl.BlockSpec((tile_m, n), lambda i: (i, 0)),
        compiler_params=pltpu.CompilerParams(
            dimension_semantics=("parallel",),      # lets v7x shard across 2 TCs
            vmem_limit_bytes=32 * 1024 * 1024,      # safe on v5e/v6e/v7x
        ),
    )()


# ---------------------------------------------------------------------------
# Wrapper: JAX/Pallas equivalent of AbstractNormalize.forward
# ---------------------------------------------------------------------------
def abstract_normalize_forward(mean, sigma, prev_lb, prev_ub):
    """prev_lb / prev_ub: (C, HW) float32, C in {1, 3}.

    Returns dict with ub, lb (flattened, shape (C*HW,)), W_upper/W_lower
    (identity), b_upper/b_lower (zeros) — mirroring the torch module.
    """
    C, HW = prev_lb.shape
    assert C in (1, 3), "Number of channels must be 1 or 3!"

    m = jnp.reshape(jnp.squeeze(mean), (-1,)).astype(jnp.float32)
    s = jnp.reshape(jnp.squeeze(sigma), (-1,)).astype(jnp.float32)
    if m.shape[0] == C:
        pass                                   # per-channel constants
    elif m.shape[0] == 1:
        m = jnp.broadcast_to(m, (C,))          # scalar mean/sigma broadcast
        s = jnp.broadcast_to(s, (C,))
    else:
        raise ValueError("mean/sigma length must be 1 or match channel count")
    inv_s = (1.0 / s).reshape(C, 1)
    bias = (-(m / s)).reshape(C, 1)

    # Avoid redundant converts if the bounds are already f32.
    if prev_ub.dtype != jnp.float32:
        prev_ub = prev_ub.astype(jnp.float32)
    if prev_lb.dtype != jnp.float32:
        prev_lb = prev_lb.astype(jnp.float32)

    # Elementwise hot path in Pallas (whole arrays fit in VMEM; no grid needed).
    ub2d, lb2d = pl.pallas_call(
        _normalize_kernel,
        out_shape=(jax.ShapeDtypeStruct((C, HW), jnp.float32),
                   jax.ShapeDtypeStruct((C, HW), jnp.float32)),
    )(inv_s, bias, prev_ub, prev_lb)

    ub = ub2d.reshape(-1)            # matches .flatten() / .squeeze(0) in torch
    lb = lb2d.reshape(-1)
    n = ub.shape[0]

    W_upper = pallas_eye(n)          # torch.eye(n) built on-device
    W_lower = W_upper
    b_upper = jnp.zeros((n,), jnp.float32)
    b_lower = jnp.zeros((n,), jnp.float32)

    return {
        "ub": ub, "lb": lb,
        "W_upper": W_upper, "W_lower": W_lower,
        "b_upper": b_upper, "b_lower": b_lower,
        "W_upper2": W_upper, "W_lower2": W_lower,
        "b_upper2": b_upper, "b_lower2": b_lower,
    }


if __name__ == "__main__":
    key = jax.random.PRNGKey(0)

    # ---------------- 3-channel case (ImageNet-style constants) --------------
    C, H, W = 3, 16, 16
    HW = H * W
    x = jax.random.uniform(key, (C, HW), dtype=jnp.float32)   # pixels in [0, 1]
    eps = jnp.float32(0.03)
    prev_lb = x - eps
    prev_ub = x + eps
    mean = jnp.array([0.485, 0.456, 0.406], jnp.float32).reshape(C, 1, 1)
    sigma = jnp.array([0.229, 0.224, 0.225], jnp.float32).reshape(C, 1, 1)

    out = abstract_normalize_forward(mean, sigma, prev_lb, prev_ub)
    out = jax.block_until_ready(out)

    m2 = mean.reshape(C, 1)
    s2 = sigma.reshape(C, 1)
    ref_ub = ((1.0 / s2) * prev_ub - m2 / s2).reshape(-1)
    ref_lb = ((1.0 / s2) * prev_lb - m2 / s2).reshape(-1)
    assert jnp.allclose(out["ub"], ref_ub, atol=1e-5)
    assert jnp.allclose(out["lb"], ref_lb, atol=1e-5)
    assert jnp.allclose(out["W_upper"], jnp.eye(C * HW, dtype=jnp.float32))
    assert jnp.all(out["b_upper"] == 0) and jnp.all(out["b_lower"] == 0)

    # ------------- 1-channel case, n = 784 (not a multiple of 128) -----------
    C1, H1, W1 = 1, 28, 28
    HW1 = H1 * W1
    x1 = jax.random.uniform(jax.random.PRNGKey(1), (C1, HW1), dtype=jnp.float32)
    prev_lb1 = x1 - eps
    prev_ub1 = x1 + eps
    mean1 = jnp.array(0.1307, jnp.float32).reshape(1, 1, 1)
    sigma1 = jnp.array(0.3081, jnp.float32).reshape(1, 1, 1)

    out1 = abstract_normalize_forward(mean1, sigma1, prev_lb1, prev_ub1)
    out1 = jax.block_until_ready(out1)

    ref_ub1 = ((1.0 / 0.3081) * prev_ub1 - 0.1307 / 0.3081).reshape(-1)
    ref_lb1 = ((1.0 / 0.3081) * prev_lb1 - 0.1307 / 0.3081).reshape(-1)
    assert jnp.allclose(out1["ub"], ref_ub1, atol=1e-5)
    assert jnp.allclose(out1["lb"], ref_lb1, atol=1e-5)
    assert jnp.allclose(out1["W_upper"], jnp.eye(C1 * HW1, dtype=jnp.float32))
    assert jnp.all(out1["b_upper"] == 0) and jnp.all(out1["b_lower"] == 0)

    print("KERNEL_OK")
</pallas_src>

<mosaic_0001>
module attributes {stable_mosaic.version = 11 : i64} {
  func.func @_normalize_kernel(%arg0: memref<3x1xf32, #tpu.memory_space<vmem>>, %arg1: memref<3x1xf32, #tpu.memory_space<vmem>>, %arg2: memref<3x256xf32, #tpu.memory_space<vmem>>, %arg3: memref<3x256xf32, #tpu.memory_space<vmem>>, %arg4: memref<3x256xf32, #tpu.memory_space<vmem>>, %arg5: memref<3x256xf32, #tpu.memory_space<vmem>>) attributes {dimension_semantics = [], scalar_prefetch = 0 : i64, scratch_operands = 0 : i64, tpu.core_type = #tpu.core_type<tc>} {
    %c0 = arith.constant 0 : index
    %c0_0 = arith.constant 0 : index
    %0 = vector.load %arg0[%c0, %c0_0] : memref<3x1xf32, #tpu.memory_space<vmem>>, vector<3x1xf32>
    %c0_1 = arith.constant 0 : index
    %c0_2 = arith.constant 0 : index
    %1 = vector.load %arg1[%c0_1, %c0_2] : memref<3x1xf32, #tpu.memory_space<vmem>>, vector<3x1xf32>
    %c0_3 = arith.constant 0 : index
    %c0_4 = arith.constant 0 : index
    %2 = vector.load %arg2[%c0_3, %c0_4] : memref<3x256xf32, #tpu.memory_space<vmem>>, vector<3x256xf32>
    %3 = vector.broadcast %0 : vector<3x1xf32> to vector<3x256xf32>
    %4 = arith.mulf %3, %2 : vector<3x256xf32>
    %5 = vector.broadcast %1 : vector<3x1xf32> to vector<3x256xf32>
    %6 = arith.addf %4, %5 : vector<3x256xf32>
    %c0_5 = arith.constant 0 : index
    %c0_6 = arith.constant 0 : index
    %7 = vector.load %arg4[%c0_5, %c0_6] : memref<3x256xf32, #tpu.memory_space<vmem>>, vector<3x256xf32>
    tpu.vector_store %arg4[%c0_5, %c0_6], %6 {strides = array<i32>} : memref<3x256xf32, #tpu.memory_space<vmem>>, vector<3x256xf32>,
    %c0_7 = arith.constant 0 : index
    %c0_8 = arith.constant 0 : index
    %8 = vector.load %arg3[%c0_7, %c0_8] : memref<3x256xf32, #tpu.memory_space<vmem>>, vector<3x256xf32>
    %9 = vector.broadcast %0 : vector<3x1xf32> to vector<3x256xf32>
    %10 = arith.mulf %9, %8 : vector<3x256xf32>
    %11 = vector.broadcast %1 : vector<3x1xf32> to vector<3x256xf32>
    %12 = arith.addf %10, %11 : vector<3x256xf32>
    %c0_9 = arith.constant 0 : index
    %c0_10 = arith.constant 0 : index
    %13 = vector.load %arg5[%c0_9, %c0_10] : memref<3x256xf32, #tpu.memory_space<vmem>>, vector<3x256xf32>
    tpu.vector_store %arg5[%c0_9, %c0_10], %12 {strides = array<i32>} : memref<3x256xf32, #tpu.memory_space<vmem>>, vector<3x256xf32>,
    return
  }
}

</mosaic_0001>

<bundles_post_ra>
// kernel: tpu_custom_call.1
= control target key start
LH: loop header
LB: loop body
LE: loop exit
PB: predicated region body
PF: predicated region fallthrough
CT: control target
= control target key end

     0   :  { %11 = vsyncpa [#allocation3], 0  ;;  %s250_s0 = inlined_call_operand.vmem [shape: f32[3,1], index: 0, kind: input, shape index: {}]   ;;  %s251_s1 = inlined_call_operand.vmem [shape: f32[3,1], index: 1, kind: input, shape index: {}]   ;;  %s252_s2 = inlined_call_operand.vmem [shape: f32[3,256], index: 2, kind: input, shape index: {}]   ;;  %s253_s3 = inlined_call_operand.hbm [shape: f32[3,256], index: 3, kind: input, shape index: {}]   ;;  %s254_s4 = inlined_call_operand.hbm [shape: f32[3,256], index: 4, kind: output, shape index: {0}]   ;;  %s255_s5 = inlined_call_operand.hbm [shape: f32[3,256], index: 5, kind: output, shape index: {1}]  }
   0x1   :  { %12 = vsyncpa [#allocation4], 0 }
   0x2   :  { %13 = vsyncpa [#allocation7], 0  ;;  %s25_s20 = sshll.u32 %s253_s3, 4  ;;  %s198_s21 = smov [#allocation2]   ;;  %s26_s20 = int_to_ptr.hbm [resolvable:$true] %s25_s20 }
   0x3   :  { %s27_s22 = sshll.u32 %s198_s21, 4  ;;  %s28_s22 = int_to_ptr.vmem [resolvable:$true] %s27_s22 }
   0x4   :  { %30 = dma.hbm_to_vmem [thread:$0]  %s26_s20, 128, %s28_s22, [#allocation3]  }
   0x5   :  { %192 = dma.done.wait [#allocation3], 128  }
   0x6   :  { %193 = vsyncadd [#allocation3], 4294967168  ;;  %v199_v0 = vmov 0   ;;  %v35_v1 = vld [vmem:[%s250_s0] sm:$0x7]  ;;  %s200_s0 = smov [#allocation5]  }
   0x7   :  { %119 = vset.pattern.permute.xlu0 %v199_v0  ;;  %v36_v2 = vld [vmem:[%s251_s1] sm:$0x7]  ;;  %v65_v6 = vld [vmem:[#allocation2] sm:$0x77]  ;;  %s87_s1 = sshll.u32 %s200_s0, 4  ;;  %vm61_vm0 = vcmask 1043456   ;;  %s88_s1 = int_to_ptr.vmem [resolvable:$true] %s87_s1 }
   0x8   :  { %40 = vperm.xlu0 %119, %v35_v1   ;;  %v37_v3 = vld [vmem:[%s252_s2] sm:$0x77]  ;;  %s89_s2 = sshll.u32 %s254_s4, 4  ;;  %s201_s30 = smov [#allocation6]   ;;  %s90_s2 = int_to_ptr.hbm [resolvable:$true] %s89_s2 }
   0x9   :  { %44 = vst [vmem:[#allocation1] ss:$2 sm:$0xff] %v37_v3  ;;  %s98_s6 = sshll.u32 %s201_s30, 4  ;;  %s100_s9 = sshll.u32 %s255_s5, 4  ;;  %s99_s6 = int_to_ptr.vmem [resolvable:$true] %s98_s6  ;;  %s101_s9 = int_to_ptr.hbm [resolvable:$true] %s100_s9 }
  0x10   :  { %53 = vperm.xlu0 %119, %v36_v2   ;;  %v45_v4 = vld.sshfl [vmem:[#allocation1] sm:$0xff pattern:$0x75316420]  ;;  %v46_v5 = vld.sshfl [vmem:[#allocation1 + $0x8] sm:$0xff pattern:$0x75316420] }
  0x11   :  { %67 = vst [vmem:[#allocation1] ss:$2 sm:$0xff] %v65_v6 }
  0x18   :  { %v69_v8 = vld.sshfl [vmem:[#allocation1 + $0x8] sm:$0xff pattern:$0x75316420]  ;;  %v68_v9 = vld.sshfl [vmem:[#allocation1] sm:$0xff pattern:$0x75316420] }
  0x7a   :  { %v41_v7 = vpop.permute.xlu0 %40 }
  0x7b   :  { %v50_v10 = vmul.f32 %v46_v5, %v41_v7  ;;  %v73_v11 = vmul.f32 %v69_v8, %v41_v7  ;;  %v49_v13 = vmul.f32 %v45_v4, %v41_v7  ;;  %v72_v14 = vmul.f32 %v68_v9, %v41_v7 }
  0x82   :  { %v54_v12 = vpop.permute.xlu0 %53 }
  0x83   :  { %v57_v15 = vadd.f32 %v54_v12, %v50_v10  ;;  %v75_v16 = vadd.f32 %v73_v11, %v54_v12  ;;  %v56_v17 = vadd.f32 %v54_v12, %v49_v13  ;;  %v74_v19 = vadd.f32 %v72_v14, %v54_v12 }
  0x85   :  { %v60_v18 = vrot.slane %v57_v15, 4  ;;  %v78_v20 = vrot.slane %v75_v16, 4 }
  0x87   :  { %v62_v21 = vsel %vm61_vm0, %v56_v17, %v60_v18  ;;  %v79_v22 = vsel %vm61_vm0, %v74_v19, %v78_v20 }
  0x88   :  { %64 = vst [vmem:[#allocation5] sm:$0x77] %v62_v21 }
  0x89   :  { %92 = dma.vmem_to_hbm [thread:$0]  %s88_s1, 128, %s90_s2, [#allocation4]   ;;  %81 = vst [vmem:[#allocation6] sm:$0x77] %v79_v22 }
  0x8a   :  { %103 = dma.vmem_to_hbm [thread:$0]  %s99_s6, 128, %s101_s9, [#allocation7]  }
  0x8b   :  { %194 = dma.done.wait [#allocation4], 128  }
  0x8c   :  { %195 = vsyncadd [#allocation4], 4294967168 }
  0x8d   :  { %196 = dma.done.wait [#allocation7], 128  }
  0x8e   :  { %197 = vsyncadd [#allocation7], 4294967168 }
  0x8f   :  { %112 = vsyncpa [#allocation3], 1 }
  0x90   :  { %113 = vsyncpa [#allocation4], 1 }
  0x91   :  { %114 = vsyncpa [#allocation7], 1 }

</bundles_post_ra>
